<compile_context>
chip_gen: v7x
topology: tpu7x:2x2x1
jax: 0.10.0
libtpu: 0.0.40
codegen_flags: <defaults>
</compile_context>

<pallas_src>
import functools

import jax
import jax.numpy as jnp
from jax import lax
from jax.experimental import pallas as pl
from jax.experimental.pallas import tpu as pltpu


def _round_up(n, m):
    return ((n + m - 1) // m) * m


def _add_norm_kernel(x_ref, s_ref, g_ref, b_ref, o_ref, *, eps, d_true):
    # x_ref, s_ref, o_ref: (block_rows, d_pad); g_ref, b_ref: (1, d_pad)
    y = x_ref[...].astype(jnp.float32) + s_ref[...].astype(jnp.float32)

    # Two lane-axis reductions (sum, sum of squares); mean/var derived from them
    # with a single hoisted 1/d constant.  Pad lanes hold zeros so the sums
    # already correspond to the true feature dimension.
    inv_d = jnp.float32(1.0 / d_true)
    row_sum = jnp.sum(y, axis=-1, keepdims=True)
    row_sumsq = jnp.sum(y * y, axis=-1, keepdims=True)
    mean = row_sum * inv_d
    var = jnp.maximum(row_sumsq * inv_d - mean * mean, 0.0)  # biased, like nn.LayerNorm
    inv = lax.rsqrt(var + eps)  # EUP rsqrt

    out = (y - mean) * inv * g_ref[...].astype(jnp.float32) + b_ref[...].astype(jnp.float32)
    o_ref[...] = out.astype(o_ref.dtype)


def add_and_norm(x, sub_out, gamma, beta, *, eps=1e-5, target_tile_bytes=2 << 20):
    """Fused (x + sub_out) followed by LayerNorm over the last dim."""
    orig_shape = x.shape
    d_model = orig_shape[-1]
    rows = 1
    for s in orig_shape[:-1]:
        rows *= s

    itemsize = jnp.dtype(x.dtype).itemsize

    # Lane-dense feature dim: pad to a multiple of 128 (>= 128).
    d_pad = _round_up(max(d_model, 128), 128)

    # Row tile: multiple of 8 sublanes, ~target_tile_bytes per input tile, so
    # (2 inputs + 1 output) x 2 pipeline buffers stays well under every chip's
    # scoped-VMEM default (v5e 16 MiB, v6e/v7x 32 MiB).
    rows_aligned = _round_up(rows, 8)
    max_block = max(8, (target_tile_bytes // (d_pad * itemsize)) // 8 * 8)
    block_rows = min(rows_aligned, max_block)
    rows_pad = _round_up(rows, block_rows)

    x2 = x.reshape(rows, d_model)
    s2 = sub_out.reshape(rows, d_model)
    pad_r = rows_pad - rows
    pad_d = d_pad - d_model
    if pad_r or pad_d:
        x2 = jnp.pad(x2, ((0, pad_r), (0, pad_d)))
        s2 = jnp.pad(s2, ((0, pad_r), (0, pad_d)))
    g2 = gamma.reshape(1, d_model)
    b2 = beta.reshape(1, d_model)
    if pad_d:
        g2 = jnp.pad(g2, ((0, 0), (0, pad_d)))
        b2 = jnp.pad(b2, ((0, 0), (0, pad_d)))

    grid = (rows_pad // block_rows,)
    kernel = functools.partial(_add_norm_kernel, eps=eps, d_true=d_model)

    cost = pl.CostEstimate(
        flops=8 * rows * d_model,
        transcendentals=rows,
        bytes_accessed=3 * rows * d_model * itemsize,
    )

    out = pl.pallas_call(
        kernel,
        out_shape=jax.ShapeDtypeStruct((rows_pad, d_pad), x.dtype),
        grid_spec=pltpu.PrefetchScalarGridSpec(
            num_scalar_prefetch=0,
            grid=grid,
            in_specs=[
                pl.BlockSpec((block_rows, d_pad), lambda i: (i, 0)),
                pl.BlockSpec((block_rows, d_pad), lambda i: (i, 0)),
                pl.BlockSpec((1, d_pad), lambda i: (0, 0)),
                pl.BlockSpec((1, d_pad), lambda i: (0, 0)),
            ],
            out_specs=pl.BlockSpec((block_rows, d_pad), lambda i: (i, 0)),
        ),
        compiler_params=pltpu.CompilerParams(
            dimension_semantics=("parallel",),
        ),
        cost_estimate=cost,
    )(x2, s2, g2, b2)

    out = out[:rows, :d_model]
    return out.reshape(orig_shape)


def reference_add_and_norm(x, sub_out, gamma, beta, eps=1e-5):
    y = x + sub_out
    mean = jnp.mean(y, axis=-1, keepdims=True)
    var = jnp.mean((y - mean) ** 2, axis=-1, keepdims=True)
    return (y - mean) / jnp.sqrt(var + eps) * gamma + beta


if __name__ == "__main__":
    key = jax.random.PRNGKey(0)
    batch, seq, d_model = 2, 8, 32

    kx, kw = jax.random.split(key)
    x = jax.random.normal(kx, (batch, seq, d_model), dtype=jnp.float32)

    # Deterministic parameters, matching nn.LayerNorm(d_model) init:
    gamma = jnp.ones((d_model,), dtype=jnp.float32)
    beta = jnp.zeros((d_model,), dtype=jnp.float32)

    # `sub` is an arbitrary callable in the PyTorch module; evaluated in plain
    # JAX here (a deterministic linear map).  Only residual-add + LayerNorm is
    # fused in the Pallas kernel.
    w_sub = jax.random.normal(kw, (d_model, d_model), dtype=jnp.float32) * 0.05
    sub = lambda t: t @ w_sub
    sub_out = sub(x)

    out = add_and_norm(x, sub_out, gamma, beta)
    out = jax.block_until_ready(out)

    ref = reference_add_and_norm(x, sub_out, gamma, beta)
    assert out.shape == (batch, seq, d_model)
    assert jnp.allclose(out, ref, atol=1e-5, rtol=1e-5), "mismatch vs reference"

    print("KERNEL_OK")
</pallas_src>

<mosaic_0001>
module attributes {stable_mosaic.version = 11 : i64} {
  func.func @_add_norm_kernel(%arg0: i32, %arg1: memref<16x128xf32, #tpu.memory_space<vmem>>, %arg2: memref<16x128xf32, #tpu.memory_space<vmem>>, %arg3: memref<1x128xf32, #tpu.memory_space<vmem>>, %arg4: memref<1x128xf32, #tpu.memory_space<vmem>>, %arg5: memref<16x128xf32, #tpu.memory_space<vmem>>) attributes {dimension_semantics = [#tpu.dimension_semantics<parallel>], iteration_bounds = array<i64: 1>, scalar_prefetch = 0 : i64, scratch_operands = 0 : i64, tpu.core_type = #tpu.core_type<tc>, window_params = [{transform_indices = @transform_0, window_bounds = array<i64: 16, 128>}, {transform_indices = @transform_1, window_bounds = array<i64: 16, 128>}, {pipeline_mode = #tpu.pipeline_mode<synchronous>, transform_indices = @transform_2, window_bounds = array<i64: 1, 128>}, {pipeline_mode = #tpu.pipeline_mode<synchronous>, transform_indices = @transform_3, window_bounds = array<i64: 1, 128>}, {transform_indices = @transform_4, window_bounds = array<i64: 16, 128>}]} {
    %c0 = arith.constant 0 : index
    %c0_0 = arith.constant 0 : index
    %0 = vector.load %arg1[%c0, %c0_0] : memref<16x128xf32, #tpu.memory_space<vmem>>, vector<16x128xf32>
    %c0_1 = arith.constant 0 : index
    %c0_2 = arith.constant 0 : index
    %1 = vector.load %arg2[%c0_1, %c0_2] : memref<16x128xf32, #tpu.memory_space<vmem>>, vector<16x128xf32>
    %2 = arith.addf %0, %1 : vector<16x128xf32>
    %cst = arith.constant dense<0.000000e+00> : vector<16xf32>
    %3 = vector.multi_reduction <add>, %2, %cst [1] : vector<16x128xf32> to vector<16xf32>
    %4 = vector.shape_cast %3 : vector<16xf32> to vector<16x1xf32>
    %5 = arith.mulf %2, %2 : vector<16x128xf32>
    %cst_3 = arith.constant dense<0.000000e+00> : vector<16xf32>
    %6 = vector.multi_reduction <add>, %5, %cst_3 [1] : vector<16x128xf32> to vector<16xf32>
    %7 = vector.shape_cast %6 : vector<16xf32> to vector<16x1xf32>
    %cst_4 = arith.constant 3.125000e-02 : f32
    %8 = vector.broadcast %cst_4 : f32 to vector<16x1xf32>
    %9 = arith.mulf %4, %8 : vector<16x1xf32>
    %cst_5 = arith.constant 3.125000e-02 : f32
    %10 = vector.broadcast %cst_5 : f32 to vector<16x1xf32>
    %11 = arith.mulf %7, %10 : vector<16x1xf32>
    %12 = arith.mulf %9, %9 : vector<16x1xf32>
    %13 = arith.subf %11, %12 : vector<16x1xf32>
    %cst_6 = arith.constant 0.000000e+00 : f32
    %14 = vector.broadcast %cst_6 : f32 to vector<16x1xf32>
    %15 = arith.maximumf %13, %14 : vector<16x1xf32>
    %cst_7 = arith.constant 9.99999974E-6 : f32
    %16 = vector.broadcast %cst_7 : f32 to vector<16x1xf32>
    %17 = arith.addf %15, %16 : vector<16x1xf32>
    %18 = math.rsqrt %17 : vector<16x1xf32>
    %19 = vector.broadcast %9 : vector<16x1xf32> to vector<16x128xf32>
    %20 = arith.subf %2, %19 : vector<16x128xf32>
    %21 = vector.broadcast %18 : vector<16x1xf32> to vector<16x128xf32>
    %22 = arith.mulf %20, %21 : vector<16x128xf32>
    %c0_8 = arith.constant 0 : index
    %c0_9 = arith.constant 0 : index
    %23 = vector.load %arg3[%c0_8, %c0_9] : memref<1x128xf32, #tpu.memory_space<vmem>>, vector<1x128xf32>
    %24 = vector.broadcast %23 : vector<1x128xf32> to vector<16x128xf32>
    %25 = arith.mulf %22, %24 : vector<16x128xf32>
    %c0_10 = arith.constant 0 : index
    %c0_11 = arith.constant 0 : index
    %26 = vector.load %arg4[%c0_10, %c0_11] : memref<1x128xf32, #tpu.memory_space<vmem>>, vector<1x128xf32>
    %27 = vector.broadcast %26 : vector<1x128xf32> to vector<16x128xf32>
    %28 = arith.addf %25, %27 : vector<16x128xf32>
    %c0_12 = arith.constant 0 : index
    %c0_13 = arith.constant 0 : index
    %29 = vector.load %arg5[%c0_12, %c0_13] : memref<16x128xf32, #tpu.memory_space<vmem>>, vector<16x128xf32>
    tpu.vector_store %arg5[%c0_12, %c0_13], %28 {strides = array<i32>} : memref<16x128xf32, #tpu.memory_space<vmem>>, vector<16x128xf32>,
    return
  }
  func.func @transform_0(%arg0: i32) -> (i32, i32) {
    %c0_i32 = arith.constant 0 : i32
    %c0_i32_0 = arith.constant 0 : i32
    return %arg0, %c0_i32 : i32, i32
  }
  func.func @transform_1(%arg0: i32) -> (i32, i32) {
    %c0_i32 = arith.constant 0 : i32
    %c0_i32_0 = arith.constant 0 : i32
    return %arg0, %c0_i32 : i32, i32
  }
  func.func @transform_2(%arg0: i32) -> (i32, i32) {
    %c0_i32 = arith.constant 0 : i32
    %c0_i32_0 = arith.constant 0 : i32
    %c0_i32_1 = arith.constant 0 : i32
    return %c0_i32, %c0_i32_0 : i32, i32
  }
  func.func @transform_3(%arg0: i32) -> (i32, i32) {
    %c0_i32 = arith.constant 0 : i32
    %c0_i32_0 = arith.constant 0 : i32
    %c0_i32_1 = arith.constant 0 : i32
    return %c0_i32, %c0_i32_0 : i32, i32
  }
  func.func @transform_4(%arg0: i32) -> (i32, i32) {
    %c0_i32 = arith.constant 0 : i32
    %c0_i32_0 = arith.constant 0 : i32
    return %arg0, %c0_i32 : i32, i32
  }
}

</mosaic_0001>

<bundles_post_ra>
// kernel: tpu_custom_call.1
= control target key start
LH: loop header
LB: loop body
LE: loop exit
PB: predicated region body
PF: predicated region fallthrough
CT: control target
= control target key end

     0   :  { %9 = vsyncpa [#allocation3], 0  ;;  %s282_s0 = inlined_call_operand.hbm [shape: f32[16,128], index: 0, kind: input, shape index: {}]   ;;  %s283_s1 = inlined_call_operand.hbm [shape: f32[16,128], index: 1, kind: input, shape index: {}]   ;;  %s284_s2 = inlined_call_operand.vmem [shape: f32[1,128], index: 2, kind: input, shape index: {}]   ;;  %s285_s3 = inlined_call_operand.vmem [shape: f32[1,128], index: 3, kind: input, shape index: {}]   ;;  %s286_s4 = inlined_call_operand.hbm [shape: f32[16,128], index: 4, kind: output, shape index: {}]  }
   0x1   :  { %10 = vsyncpa [#allocation6], 0 }
   0x2   :  { %11 = vsyncpa [#allocation4], 0  ;;  %s201_s15 = smov [#allocation2]   ;;  %s129_s19 = scalar_lea.hbm %s282_s0, 256 }
   0x3   :  { %s17_s16 = sshll.u32 %s201_s15, 4  ;;  %p130_p0 = scmp.ne.s32.totalorder %s282_s0, %s129_s19  ;;  %s18_s16 = int_to_ptr.vmem [resolvable:$true] %s17_s16 }
   0x4   :  { %p133_p1 = scmp.lt.u32.totalorder %s129_s19, %s282_s0 }
   0x6   :  { %p135_p2 = pnand %p133_p1, %p130_p0 }
   0x8   :  { %138 = shalt.err (!%p135_p2)
}
   0x9   :  { %s139_s24 = scalar_lea.vmem %s18_s16, 256  ;;  %p144_p4 = scmp.lt.s32.totalorder %s18_s16, %s18_s16 }
   0xa   :  { %p140_p3 = scmp.ne.s32.totalorder %s18_s16, %s139_s24  ;;  %p145_p5 = scmp.lt.s32.totalorder %s139_s24, %s139_s24 }
   0xc   :  { %p146_p6 = por %p145_p5, %p144_p4 }
   0xe   :  { %p147_p7 = pnand %p146_p6, %p140_p3 }
  0x10   :  { %150 = shalt.err (!%p147_p7)
}
  0x11   :  { %s202_s25 = smov 128   ;;  %s203_s26 = smov 8  }
  0x12   :  { %23 = dma.hbm_to_vmem [thread:$0]  %s282_s0, 256, %s18_s16, [#allocation3], %s202_s25, %s202_s25, %s203_s26  }
  0x13   :  { %s204_s29 = smov [#allocation5]   ;;  %s151_s7 = scalar_lea.hbm %s283_s1, 256 }
  0x14   :  { %s29_s30 = sshll.u32 %s204_s29, 4  ;;  %p152_p8 = scmp.ne.s32.totalorder %s283_s1, %s151_s7  ;;  %s30_s30 = int_to_ptr.vmem [resolvable:$true] %s29_s30 }
  0x15   :  { %p155_p9 = scmp.lt.u32.totalorder %s151_s7, %s283_s1 }
  0x17   :  { %p157_p10 = pnand %p155_p9, %p152_p8 }
  0x19   :  { %160 = shalt.err (!%p157_p10)
}
  0x1a   :  { %s161_s12 = scalar_lea.vmem %s30_s30, 256  ;;  %p166_p12 = scmp.lt.s32.totalorder %s30_s30, %s30_s30 }
  0x1b   :  { %p162_p11 = scmp.ne.s32.totalorder %s30_s30, %s161_s12  ;;  %p167_p13 = scmp.lt.s32.totalorder %s161_s12, %s161_s12 }
  0x1d   :  { %p168_p0 = por %p167_p13, %p166_p12 }
  0x1f   :  { %p169_p1 = pnand %p168_p0, %p162_p11 }
  0x21   :  { %172 = shalt.err (!%p169_p1)
}
  0x22   :  { %35 = dma.hbm_to_vmem [thread:$0]  %s283_s1, 256, %s30_s30, [#allocation6], %s202_s25, %s202_s25, %s203_s26  }
  0x23   :  { %195 = dma.done.wait [#allocation3], 256  }
  0x24   :  { %196 = vsyncadd [#allocation3], 4294967040 }
  0x25   :  { %197 = dma.done.wait [#allocation6], 256  }
  0x26   :  { %198 = vsyncadd [#allocation6], 4294967040  ;;  %v46_v0 = vld [vmem:[#allocation2] sm:$0xff]  ;;  %v48_v1 = vld [vmem:[#allocation5] sm:$0xff]  ;;  %s205_s17 = smov [#allocation7]  }
  0x27   :  { %v47_v2 = vld [vmem:[#allocation2 + $0x8] sm:$0xff]  ;;  %v50_v3 = vadd.f32 %v48_v1, %v46_v0  ;;  %v49_v4 = vld [vmem:[#allocation5 + $0x8] sm:$0xff]  ;;  %v118_v26 = vld [vmem:[%s284_s2] ss:$0 sm:$0xff]  ;;  %s105_s18 = sshll.u32 %s205_s17, 4  ;;  %s106_s18 = int_to_ptr.vmem [resolvable:$true] %s105_s18 }
  0x28   :  { %v51_v5 = vadd.f32 %v49_v4, %v47_v2  ;;  %v119_v28 = vld [vmem:[%s285_s3] ss:$0 sm:$0xff]  ;;  %s173_s19 = scalar_lea.vmem %s106_s18, 256  ;;  %p178_p3 = scmp.lt.s32.totalorder %s106_s18, %s106_s18 }
  0x29   :  { %52 = vadd.xlane.f32.xlu0 %v50_v3  ;;  %v56_v6 = vmul.f32 %v50_v3, %v50_v3  ;;  %p174_p2 = scmp.ne.s32.totalorder %s106_s18, %s173_s19  ;;  %p179_p4 = scmp.lt.s32.totalorder %s173_s19, %s173_s19 }
  0x2a   :  { %v57_v7 = vmul.f32 %v51_v5, %v51_v5 }
  0x2b   :  { %58 = vadd.xlane.f32.xlu1 %v56_v6  ;;  %p180_p5 = por %p179_p4, %p178_p3 }
  0x2d   :  { %54 = vadd.xlane.f32.xlu0 %v51_v5  ;;  %p181_p6 = pnand %p180_p5, %p174_p2 }
  0x2f   :  { %60 = vadd.xlane.f32.xlu1 %v57_v7 }
  0xb6   :  { %v53_v8 = vpop.xlane.xlu0 %52 }
  0xb7   :  { %v62_v9 = vmul.f32 0.03125, %v53_v8 }
  0xb8   :  { %v59_v10 = vpop.xlane.xlu1 %58 }
  0xb9   :  { %v66_v11 = vmul.f32 %v62_v9, %v62_v9  ;;  %v64_v12 = vmul.f32 0.03125, %v59_v10  ;;  %v76_v24 = vsub.f32 %v50_v3, %v62_v9 }
  0xba   :  { %v55_v13 = vpop.xlane.xlu0 %54 }
  0xbb   :  { %v68_v14 = vsub.f32 %v64_v12, %v66_v11  ;;  %v63_v15 = vmul.f32 0.03125, %v55_v13 }
  0xbc   :  { %v61_v16 = vpop.xlane.xlu1 %60 }
  0xbd   :  { %v70_v17 = vmax.f32 %v68_v14, 0.0  ;;  %v67_v18 = vmul.f32 %v63_v15, %v63_v15  ;;  %v65_v19 = vmul.f32 0.03125, %v61_v16  ;;  %v77_v29 = vsub.f32 %v51_v5, %v63_v15 }
  0xbf   :  { %v72_v20 = vadd.f32 1e-05, %v70_v17  ;;  %v69_v21 = vsub.f32 %v65_v19, %v67_v18 }
  0xc1   :  { %125 = vrsqrt.f32 %v72_v20  ;;  %v71_v22 = vmax.f32 %v69_v21, 0.0 }
  0xc3   :  { %v73_v23 = vadd.f32 1e-05, %v71_v22 }
  0xc5   :  { %127 = vrsqrt.f32 %v73_v23 }
  0xcb   :  { %v126_v25 = vpop.eup %125 }
  0xcc   :  { %v78_v27 = vmul.f32 %v126_v25, %v76_v24 }
  0xce   :  { %v87_v30 = vmul.f32 %v118_v26, %v78_v27 }
  0xcf   :  { %v128_v31 = vpop.eup %127 }
  0xd0   :  { %v79_v32 = vmul.f32 %v128_v31, %v77_v29  ;;  %v96_v33 = vadd.f32 %v119_v28, %v87_v30 }
  0xd2   :  { %v88_v34 = vmul.f32 %v118_v26, %v79_v32  ;;  %98 = vst [vmem:[#allocation7] sm:$0xff] %v96_v33 }
  0xd4   :  { %v97_v35 = vadd.f32 %v119_v28, %v88_v34 }
  0xd6   :  { %99 = vst [vmem:[#allocation7 + $0x8] sm:$0xff] %v97_v35 }
  0xd7   :  { %184 = shalt.err (!%p181_p6)
}
  0xd8   :  { %s185_s20 = scalar_lea.hbm %s286_s4, 256 }
  0xd9   :  { %p186_p7 = scmp.ne.s32.totalorder %s286_s4, %s185_s20  ;;  %p189_p8 = scmp.lt.u32.totalorder %s185_s20, %s286_s4 }
  0xdb   :  { %p191_p9 = pnand %p189_p8, %p186_p7 }
  0xdd   :  { %194 = shalt.err (!%p191_p9)
}
  0xde   :  { %111 = dma.vmem_to_hbm [thread:$0]  %s106_s18, 256, %s286_s4, [#allocation4], %s202_s25, %s202_s25, %s203_s26  }
  0xdf   :  { %199 = dma.done.wait [#allocation4], 256  }
  0xe0   :  { %200 = vsyncadd [#allocation4], 4294967040 }
  0xe1   :  { %115 = vsyncpa [#allocation3], 1 }
  0xe2   :  { %116 = vsyncpa [#allocation6], 1 }
  0xe3   :  { %117 = vsyncpa [#allocation4], 1 }

</bundles_post_ra>
